<compile_context>
chip_gen: v7x
topology: tpu7x:2x2x1
jax: 0.10.0
libtpu: 0.0.40
codegen_flags: <defaults>
</compile_context>

<pallas_src>
import functools

import jax
import jax.numpy as jnp
import numpy as np
from jax.experimental import pallas as pl
from jax.experimental.pallas import tpu as pltpu


_TARGET_TILE_ELEMS = 32768  # ~128 KiB of f32 per tile buffer; tiny vs any chip's VMEM.


def _pick_tile(H, W):
    """Pick a (TH, TW) output tile: lane dim multiple of 128 (or full W),
    sublane dim multiple of 8 (or full H)."""
    if W >= 128:
        TW = min(512, (W // 128) * 128)
    else:
        TW = W
    if H >= 8:
        TH = max(8, min((_TARGET_TILE_ELEMS // TW) // 8 * 8, (H // 8) * 8))
    else:
        TH = H
    return TH, TW


def _accumulate(params_ref, K, gx, gy):
    """sum_k w_k * exp(d2 * (-1/(2*width_k^2))) over the current (TH, TW) pixel tile.

    params_ref: (B, 4K) f32 SMEM ref holding [cx, cy, w, -1/(2*width^2)] per (b, k).
    """
    b = pl.program_id(0)

    def body(k, acc):
        base = 4 * k
        cx = params_ref[b, base + 0]
        cy = params_ref[b, base + 1]
        w = params_ref[b, base + 2]
        neg_inv = params_ref[b, base + 3]          # == -1 / (2 * exp(log_w)^2)
        dx = gx - cx
        dy = gy - cy
        d2 = dx * dx + dy * dy
        return acc + w * jnp.exp(d2 * neg_inv)

    acc0 = jnp.zeros(gx.shape, jnp.float32)
    return jax.lax.fori_loop(0, K, body, acc0, unroll=True)


def _rbf_kernel_coords(params_ref, gx_ref, gy_ref, o_ref, *, K):
    # gx_ref/gy_ref/o_ref: (1, TH, TW) f32 tiles; params_ref: (B, 4K) f32 in SMEM.
    o_ref[0] = _accumulate(params_ref, K, gx_ref[0], gy_ref[0])


def _rbf_kernel_iota(params_ref, o_ref, *, K, TH, TW):
    # Coordinate-free fast path: generate the standard meshgrid coords for this tile.
    i = pl.program_id(1)
    j = pl.program_id(2)
    rows = jax.lax.broadcasted_iota(jnp.int32, (TH, TW), 0) + i * TH
    cols = jax.lax.broadcasted_iota(jnp.int32, (TH, TW), 1) + j * TW
    gy = rows.astype(jnp.float32)   # row index  == grid[..., 1] (r_grid)
    gx = cols.astype(jnp.float32)   # col index  == grid[..., 0] (c_grid)
    o_ref[0] = _accumulate(params_ref, K, gx, gy)


def rbf_forward(grid, weights, centers, log_widths, bias=None, *, standard_grid=False):
    """grid: (B,H,W,2) with last axis = (x=col, y=row); weights/log_widths/bias: (B,K);
    centers: (B,K,2).  Returns (B,H,W) f32, matching the PyTorch module's forward.

    standard_grid=True skips reading `grid` entirely and generates the module's
    standard meshgrid coordinates (grid[b, r, c] == (c, r)) inside the kernel.
    """
    del bias  # present as a module parameter but unused in the PyTorch forward
    grid = jnp.asarray(grid, jnp.float32)
    B, H, W, _ = grid.shape
    K = weights.shape[-1]

    # Pack per-(b,k) scalars for SMEM: [cx, cy, w, -1/(2*width^2)].
    neg_inv = -0.5 * jnp.exp(-2.0 * log_widths.astype(jnp.float32))
    params = jnp.stack(
        [centers[..., 0].astype(jnp.float32),
         centers[..., 1].astype(jnp.float32),
         weights.astype(jnp.float32),
         neg_inv],
        axis=-1,
    ).reshape(B, 4 * K)

    TH, TW = _pick_tile(H, W)
    pgrid = (B, pl.cdiv(H, TH), pl.cdiv(W, TW))

    tile_spec = pl.BlockSpec((1, TH, TW), lambda b, i, j: (b, i, j))
    smem_spec = pl.BlockSpec(memory_space=pltpu.MemorySpace.SMEM)

    if standard_grid:
        kernel = functools.partial(_rbf_kernel_iota, K=K, TH=TH, TW=TW)
        in_specs = [smem_spec]
        args = (params,)
    else:
        gx = grid[..., 0]   # (B, H, W) x (column) coordinate of every pixel
        gy = grid[..., 1]   # (B, H, W) y (row) coordinate of every pixel
        kernel = functools.partial(_rbf_kernel_coords, K=K)
        in_specs = [smem_spec, tile_spec, tile_spec]
        args = (params, gx, gy)

    return pl.pallas_call(
        kernel,
        out_shape=jax.ShapeDtypeStruct((B, H, W), jnp.float32),
        grid_spec=pltpu.PrefetchScalarGridSpec(
            num_scalar_prefetch=0,
            grid=pgrid,
            in_specs=in_specs,
            out_specs=tile_spec,
        ),
        compiler_params=pltpu.CompilerParams(
            dimension_semantics=("parallel", "parallel", "parallel"),
            vmem_limit_bytes=32 * 1024 * 1024,
        ),
    )(*args)


def rbf_reference(grid, weights, centers, log_widths):
    """Pure-JAX transcription of the PyTorch forward (for verification)."""
    g = grid[:, None]                                   # (B,1,H,W,2)
    c = centers[:, :, None, None, :]                    # (B,K,1,1,2)
    w = weights[:, :, None, None]                       # (B,K,1,1)
    widths = jnp.exp(log_widths)
    denom = (2.0 * widths ** 2)[:, :, None, None]       # (B,K,1,1)
    d2 = jnp.sum((g - c) ** 2, axis=4)                  # (B,K,H,W)
    return jnp.sum(w * jnp.exp(-d2 / denom), axis=1)    # (B,H,W)


if __name__ == "__main__":
    def standard_grid_coords(B, H, W):
        # coords = (c_grid, r_grid), as in the module's __init__.
        r = jnp.arange(H, dtype=jnp.float32)
        c = jnp.arange(W, dtype=jnp.float32)
        r_grid, c_grid = jnp.meshgrid(r, c, indexing="ij")
        return jnp.broadcast_to(jnp.stack([c_grid, r_grid], axis=-1), (B, H, W, 2))

    key = jax.random.PRNGKey(0)

    # Small test + the module's actual image_shape (101, 91) to exercise tiling.
    for (B, K, H, W) in [(2, 8, 16, 16), (1, 6, 101, 91)]:
        key, k1, k2, k3, k4 = jax.random.split(key, 5)
        weights = jax.random.normal(k1, (B, K), dtype=jnp.float32)
        centers = jax.random.uniform(k2, (B, K, 2), dtype=jnp.float32) * jnp.array(
            [W - 1, H - 1], dtype=jnp.float32)
        log_widths = 0.3 * jax.random.normal(k3, (B, K), dtype=jnp.float32) + jnp.log(5.0)
        bias = jax.random.normal(k4, (B, K), dtype=jnp.float32)   # unused in forward

        grid = standard_grid_coords(B, H, W)
        ref = rbf_reference(grid, weights, centers, log_widths)

        # General path: arbitrary per-batch coordinate grid read from HBM.
        out_general = jax.block_until_ready(
            rbf_forward(grid, weights, centers, log_widths, bias))
        np.testing.assert_allclose(np.asarray(out_general), np.asarray(ref),
                                   rtol=2e-5, atol=1e-5)

        # Fast path: coordinates generated in-kernel (standard meshgrid only).
        out_fast = jax.block_until_ready(
            rbf_forward(grid, weights, centers, log_widths, bias, standard_grid=True))
        np.testing.assert_allclose(np.asarray(out_fast), np.asarray(ref),
                                   rtol=2e-5, atol=1e-5)

    print("KERNEL_OK")
</pallas_src>

<mosaic_0001>
module attributes {stable_mosaic.version = 11 : i64} {
  func.func @_rbf_kernel_coords(%arg0: i32, %arg1: i32, %arg2: i32, %arg3: memref<2x32xf32, #tpu.memory_space<smem>>, %arg4: memref<1x16x16xf32, #tpu.memory_space<vmem>>, %arg5: memref<1x16x16xf32, #tpu.memory_space<vmem>>, %arg6: memref<1x16x16xf32, #tpu.memory_space<vmem>>) attributes {dimension_semantics = [#tpu.dimension_semantics<parallel>, #tpu.dimension_semantics<parallel>, #tpu.dimension_semantics<parallel>], iteration_bounds = array<i64: 2, 1, 1>, scalar_prefetch = 0 : i64, scratch_operands = 0 : i64, tpu.core_type = #tpu.core_type<tc>, window_params = [{transform_indices = @transform_0, window_bounds = array<i64: 2, 32>}, {transform_indices = @transform_1, window_bounds = array<i64: 1, 16, 16>}, {transform_indices = @transform_2, window_bounds = array<i64: 1, 16, 16>}, {transform_indices = @transform_3, window_bounds = array<i64: 1, 16, 16>}]} {
    %c0 = arith.constant 0 : index
    %c0_0 = arith.constant 0 : index
    %c0_1 = arith.constant 0 : index
    %0 = vector.load %arg4[%c0, %c0_0, %c0_1] : memref<1x16x16xf32, #tpu.memory_space<vmem>>, vector<1x16x16xf32>
    %1 = vector.shape_cast %0 : vector<1x16x16xf32> to vector<16x16xf32>
    %c0_2 = arith.constant 0 : index
    %c0_3 = arith.constant 0 : index
    %c0_4 = arith.constant 0 : index
    %2 = vector.load %arg5[%c0_2, %c0_3, %c0_4] : memref<1x16x16xf32, #tpu.memory_space<vmem>>, vector<1x16x16xf32>
    %3 = vector.shape_cast %2 : vector<1x16x16xf32> to vector<16x16xf32>
    %cst = arith.constant 0.000000e+00 : f32
    %4 = vector.broadcast %cst : f32 to vector<16x16xf32>
    %c0_i32 = arith.constant 0 : i32
    %c4_i32 = arith.constant 4 : i32
    %5 = arith.muli %c4_i32, %c0_i32 : i32
    %c0_i32_5 = arith.constant 0 : i32
    %6 = arith.addi %5, %c0_i32_5 : i32
    %7 = arith.index_cast %arg0 : i32 to index
    %8 = arith.index_cast %6 : i32 to index
    %9 = memref.load %arg3[%7, %8] : memref<2x32xf32, #tpu.memory_space<smem>>
    %c1_i32 = arith.constant 1 : i32
    %10 = arith.addi %5, %c1_i32 : i32
    %11 = arith.index_cast %arg0 : i32 to index
    %12 = arith.index_cast %10 : i32 to index
    %13 = memref.load %arg3[%11, %12] : memref<2x32xf32, #tpu.memory_space<smem>>
    %c2_i32 = arith.constant 2 : i32
    %14 = arith.addi %5, %c2_i32 : i32
    %15 = arith.index_cast %arg0 : i32 to index
    %16 = arith.index_cast %14 : i32 to index
    %17 = memref.load %arg3[%15, %16] : memref<2x32xf32, #tpu.memory_space<smem>>
    %c3_i32 = arith.constant 3 : i32
    %18 = arith.addi %5, %c3_i32 : i32
    %19 = arith.index_cast %arg0 : i32 to index
    %20 = arith.index_cast %18 : i32 to index
    %21 = memref.load %arg3[%19, %20] : memref<2x32xf32, #tpu.memory_space<smem>>
    %22 = vector.broadcast %9 : f32 to vector<16x16xf32>
    %23 = arith.subf %1, %22 : vector<16x16xf32>
    %24 = vector.broadcast %13 : f32 to vector<16x16xf32>
    %25 = arith.subf %3, %24 : vector<16x16xf32>
    %26 = arith.mulf %23, %23 : vector<16x16xf32>
    %27 = arith.mulf %25, %25 : vector<16x16xf32>
    %28 = arith.addf %26, %27 : vector<16x16xf32>
    %29 = vector.broadcast %21 : f32 to vector<16x16xf32>
    %30 = arith.mulf %28, %29 : vector<16x16xf32>
    %31 = math.exp %30 : vector<16x16xf32>
    %32 = vector.broadcast %17 : f32 to vector<16x16xf32>
    %33 = arith.mulf %32, %31 : vector<16x16xf32>
    %34 = arith.addf %4, %33 : vector<16x16xf32>
    %c1_i32_6 = arith.constant 1 : i32
    %c4_i32_7 = arith.constant 4 : i32
    %35 = arith.muli %c4_i32_7, %c1_i32_6 : i32
    %c0_i32_8 = arith.constant 0 : i32
    %36 = arith.addi %35, %c0_i32_8 : i32
    %37 = arith.index_cast %arg0 : i32 to index
    %38 = arith.index_cast %36 : i32 to index
    %39 = memref.load %arg3[%37, %38] : memref<2x32xf32, #tpu.memory_space<smem>>
    %c1_i32_9 = arith.constant 1 : i32
    %40 = arith.addi %35, %c1_i32_9 : i32
    %41 = arith.index_cast %arg0 : i32 to index
    %42 = arith.index_cast %40 : i32 to index
    %43 = memref.load %arg3[%41, %42] : memref<2x32xf32, #tpu.memory_space<smem>>
    %c2_i32_10 = arith.constant 2 : i32
    %44 = arith.addi %35, %c2_i32_10 : i32
    %45 = arith.index_cast %arg0 : i32 to index
    %46 = arith.index_cast %44 : i32 to index
    %47 = memref.load %arg3[%45, %46] : memref<2x32xf32, #tpu.memory_space<smem>>
    %c3_i32_11 = arith.constant 3 : i32
    %48 = arith.addi %35, %c3_i32_11 : i32
    %49 = arith.index_cast %arg0 : i32 to index
    %50 = arith.index_cast %48 : i32 to index
    %51 = memref.load %arg3[%49, %50] : memref<2x32xf32, #tpu.memory_space<smem>>
    %52 = vector.broadcast %39 : f32 to vector<16x16xf32>
    %53 = arith.subf %1, %52 : vector<16x16xf32>
    %54 = vector.broadcast %43 : f32 to vector<16x16xf32>
    %55 = arith.subf %3, %54 : vector<16x16xf32>
    %56 = arith.mulf %53, %53 : vector<16x16xf32>
    %57 = arith.mulf %55, %55 : vector<16x16xf32>
    %58 = arith.addf %56, %57 : vector<16x16xf32>
    %59 = vector.broadcast %51 : f32 to vector<16x16xf32>
    %60 = arith.mulf %58, %59 : vector<16x16xf32>
    %61 = math.exp %60 : vector<16x16xf32>
    %62 = vector.broadcast %47 : f32 to vector<16x16xf32>
    %63 = arith.mulf %62, %61 : vector<16x16xf32>
    %64 = arith.addf %34, %63 : vector<16x16xf32>
    %c2_i32_12 = arith.constant 2 : i32
    %c4_i32_13 = arith.constant 4 : i32
    %65 = arith.muli %c4_i32_13, %c2_i32_12 : i32
    %c0_i32_14 = arith.constant 0 : i32
    %66 = arith.addi %65, %c0_i32_14 : i32
    %67 = arith.index_cast %arg0 : i32 to index
    %68 = arith.index_cast %66 : i32 to index
    %69 = memref.load %arg3[%67, %68] : memref<2x32xf32, #tpu.memory_space<smem>>
    %c1_i32_15 = arith.constant 1 : i32
    %70 = arith.addi %65, %c1_i32_15 : i32
    %71 = arith.index_cast %arg0 : i32 to index
    %72 = arith.index_cast %70 : i32 to index
    %73 = memref.load %arg3[%71, %72] : memref<2x32xf32, #tpu.memory_space<smem>>
    %c2_i32_16 = arith.constant 2 : i32
    %74 = arith.addi %65, %c2_i32_16 : i32
    %75 = arith.index_cast %arg0 : i32 to index
    %76 = arith.index_cast %74 : i32 to index
    %77 = memref.load %arg3[%75, %76] : memref<2x32xf32, #tpu.memory_space<smem>>
    %c3_i32_17 = arith.constant 3 : i32
    %78 = arith.addi %65, %c3_i32_17 : i32
    %79 = arith.index_cast %arg0 : i32 to index
    %80 = arith.index_cast %78 : i32 to index
    %81 = memref.load %arg3[%79, %80] : memref<2x32xf32, #tpu.memory_space<smem>>
    %82 = vector.broadcast %69 : f32 to vector<16x16xf32>
    %83 = arith.subf %1, %82 : vector<16x16xf32>
    %84 = vector.broadcast %73 : f32 to vector<16x16xf32>
    %85 = arith.subf %3, %84 : vector<16x16xf32>
    %86 = arith.mulf %83, %83 : vector<16x16xf32>
    %87 = arith.mulf %85, %85 : vector<16x16xf32>
    %88 = arith.addf %86, %87 : vector<16x16xf32>
    %89 = vector.broadcast %81 : f32 to vector<16x16xf32>
    %90 = arith.mulf %88, %89 : vector<16x16xf32>
    %91 = math.exp %90 : vector<16x16xf32>
    %92 = vector.broadcast %77 : f32 to vector<16x16xf32>
    %93 = arith.mulf %92, %91 : vector<16x16xf32>
    %94 = arith.addf %64, %93 : vector<16x16xf32>
    %c3_i32_18 = arith.constant 3 : i32
    %c4_i32_19 = arith.constant 4 : i32
    %95 = arith.muli %c4_i32_19, %c3_i32_18 : i32
    %c0_i32_20 = arith.constant 0 : i32
    %96 = arith.addi %95, %c0_i32_20 : i32
    %97 = arith.index_cast %arg0 : i32 to index
    %98 = arith.index_cast %96 : i32 to index
    %99 = memref.load %arg3[%97, %98] : memref<2x32xf32, #tpu.memory_space<smem>>
    %c1_i32_21 = arith.constant 1 : i32
    %100 = arith.addi %95, %c1_i32_21 : i32
    %101 = arith.index_cast %arg0 : i32 to index
    %102 = arith.index_cast %100 : i32 to index
    %103 = memref.load %arg3[%101, %102] : memref<2x32xf32, #tpu.memory_space<smem>>
    %c2_i32_22 = arith.constant 2 : i32
    %104 = arith.addi %95, %c2_i32_22 : i32
    %105 = arith.index_cast %arg0 : i32 to index
    %106 = arith.index_cast %104 : i32 to index
    %107 = memref.load %arg3[%105, %106] : memref<2x32xf32, #tpu.memory_space<smem>>
    %c3_i32_23 = arith.constant 3 : i32
    %108 = arith.addi %95, %c3_i32_23 : i32
    %109 = arith.index_cast %arg0 : i32 to index
    %110 = arith.index_cast %108 : i32 to index
    %111 = memref.load %arg3[%109, %110] : memref<2x32xf32, #tpu.memory_space<smem>>
    %112 = vector.broadcast %99 : f32 to vector<16x16xf32>
    %113 = arith.subf %1, %112 : vector<16x16xf32>
    %114 = vector.broadcast %103 : f32 to vector<16x16xf32>
    %115 = arith.subf %3, %114 : vector<16x16xf32>
    %116 = arith.mulf %113, %113 : vector<16x16xf32>
    %117 = arith.mulf %115, %115 : vector<16x16xf32>
    %118 = arith.addf %116, %117 : vector<16x16xf32>
    %119 = vector.broadcast %111 : f32 to vector<16x16xf32>
    %120 = arith.mulf %118, %119 : vector<16x16xf32>
    %121 = math.exp %120 : vector<16x16xf32>
    %122 = vector.broadcast %107 : f32 to vector<16x16xf32>
    %123 = arith.mulf %122, %121 : vector<16x16xf32>
    %124 = arith.addf %94, %123 : vector<16x16xf32>
    %c4_i32_24 = arith.constant 4 : i32
    %c4_i32_25 = arith.constant 4 : i32
    %125 = arith.muli %c4_i32_25, %c4_i32_24 : i32
    %c0_i32_26 = arith.constant 0 : i32
    %126 = arith.addi %125, %c0_i32_26 : i32
    %127 = arith.index_cast %arg0 : i32 to index
    %128 = arith.index_cast %126 : i32 to index
    %129 = memref.load %arg3[%127, %128] : memref<2x32xf32, #tpu.memory_space<smem>>
    %c1_i32_27 = arith.constant 1 : i32
    %130 = arith.addi %125, %c1_i32_27 : i32
    %131 = arith.index_cast %arg0 : i32 to index
    %132 = arith.index_cast %130 : i32 to index
    %133 = memref.load %arg3[%131, %132] : memref<2x32xf32, #tpu.memory_space<smem>>
    %c2_i32_28 = arith.constant 2 : i32
    %134 = arith.addi %125, %c2_i32_28 : i32
    %135 = arith.index_cast %arg0 : i32 to index
    %136 = arith.index_cast %134 : i32 to index
    %137 = memref.load %arg3[%135, %136] : memref<2x32xf32, #tpu.memory_space<smem>>
    %c3_i32_29 = arith.constant 3 : i32
    %138 = arith.addi %125, %c3_i32_29 : i32
    %139 = arith.index_cast %arg0 : i32 to index
    %140 = arith.index_cast %138 : i32 to index
    %141 = memref.load %arg3[%139, %140] : memref<2x32xf32, #tpu.memory_space<smem>>
    %142 = vector.broadcast %129 : f32 to vector<16x16xf32>
    %143 = arith.subf %1, %142 : vector<16x16xf32>
    %144 = vector.broadcast %133 : f32 to vector<16x16xf32>
    %145 = arith.subf %3, %144 : vector<16x16xf32>
    %146 = arith.mulf %143, %143 : vector<16x16xf32>
    %147 = arith.mulf %145, %145 : vector<16x16xf32>
    %148 = arith.addf %146, %147 : vector<16x16xf32>
    %149 = vector.broadcast %141 : f32 to vector<16x16xf32>
    %150 = arith.mulf %148, %149 : vector<16x16xf32>
    %151 = math.exp %150 : vector<16x16xf32>
    %152 = vector.broadcast %137 : f32 to vector<16x16xf32>
    %153 = arith.mulf %152, %151 : vector<16x16xf32>
    %154 = arith.addf %124, %153 : vector<16x16xf32>
    %c5_i32 = arith.constant 5 : i32
    %c4_i32_30 = arith.constant 4 : i32
    %155 = arith.muli %c4_i32_30, %c5_i32 : i32
    %c0_i32_31 = arith.constant 0 : i32
    %156 = arith.addi %155, %c0_i32_31 : i32
    %157 = arith.index_cast %arg0 : i32 to index
    %158 = arith.index_cast %156 : i32 to index
    %159 = memref.load %arg3[%157, %158] : memref<2x32xf32, #tpu.memory_space<smem>>
    %c1_i32_32 = arith.constant 1 : i32
    %160 = arith.addi %155, %c1_i32_32 : i32
    %161 = arith.index_cast %arg0 : i32 to index
    %162 = arith.index_cast %160 : i32 to index
    %163 = memref.load %arg3[%161, %162] : memref<2x32xf32, #tpu.memory_space<smem>>
    %c2_i32_33 = arith.constant 2 : i32
    %164 = arith.addi %155, %c2_i32_33 : i32
    %165 = arith.index_cast %arg0 : i32 to index
    %166 = arith.index_cast %164 : i32 to index
    %167 = memref.load %arg3[%165, %166] : memref<2x32xf32, #tpu.memory_space<smem>>
    %c3_i32_34 = arith.constant 3 : i32
    %168 = arith.addi %155, %c3_i32_34 : i32
    %169 = arith.index_cast %arg0 : i32 to index
    %170 = arith.index_cast %168 : i32 to index
    %171 = memref.load %arg3[%169, %170] : memref<2x32xf32, #tpu.memory_space<smem>>
    %172 = vector.broadcast %159 : f32 to vector<16x16xf32>
    %173 = arith.subf %1, %172 : vector<16x16xf32>
    %174 = vector.broadcast %163 : f32 to vector<16x16xf32>
    %175 = arith.subf %3, %174 : vector<16x16xf32>
    %176 = arith.mulf %173, %173 : vector<16x16xf32>
    %177 = arith.mulf %175, %175 : vector<16x16xf32>
    %178 = arith.addf %176, %177 : vector<16x16xf32>
    %179 = vector.broadcast %171 : f32 to vector<16x16xf32>
    %180 = arith.mulf %178, %179 : vector<16x16xf32>
    %181 = math.exp %180 : vector<16x16xf32>
    %182 = vector.broadcast %167 : f32 to vector<16x16xf32>
    %183 = arith.mulf %182, %181 : vector<16x16xf32>
    %184 = arith.addf %154, %183 : vector<16x16xf32>
    %c6_i32 = arith.constant 6 : i32
    %c4_i32_35 = arith.constant 4 : i32
    %185 = arith.muli %c4_i32_35, %c6_i32 : i32
    %c0_i32_36 = arith.constant 0 : i32
    %186 = arith.addi %185, %c0_i32_36 : i32
    %187 = arith.index_cast %arg0 : i32 to index
    %188 = arith.index_cast %186 : i32 to index
    %189 = memref.load %arg3[%187, %188] : memref<2x32xf32, #tpu.memory_space<smem>>
    %c1_i32_37 = arith.constant 1 : i32
    %190 = arith.addi %185, %c1_i32_37 : i32
    %191 = arith.index_cast %arg0 : i32 to index
    %192 = arith.index_cast %190 : i32 to index
    %193 = memref.load %arg3[%191, %192] : memref<2x32xf32, #tpu.memory_space<smem>>
    %c2_i32_38 = arith.constant 2 : i32
    %194 = arith.addi %185, %c2_i32_38 : i32
    %195 = arith.index_cast %arg0 : i32 to index
    %196 = arith.index_cast %194 : i32 to index
    %197 = memref.load %arg3[%195, %196] : memref<2x32xf32, #tpu.memory_space<smem>>
    %c3_i32_39 = arith.constant 3 : i32
    %198 = arith.addi %185, %c3_i32_39 : i32
    %199 = arith.index_cast %arg0 : i32 to index
    %200 = arith.index_cast %198 : i32 to index
    %201 = memref.load %arg3[%199, %200] : memref<2x32xf32, #tpu.memory_space<smem>>
    %202 = vector.broadcast %189 : f32 to vector<16x16xf32>
    %203 = arith.subf %1, %202 : vector<16x16xf32>
    %204 = vector.broadcast %193 : f32 to vector<16x16xf32>
    %205 = arith.subf %3, %204 : vector<16x16xf32>
    %206 = arith.mulf %203, %203 : vector<16x16xf32>
    %207 = arith.mulf %205, %205 : vector<16x16xf32>
    %208 = arith.addf %206, %207 : vector<16x16xf32>
    %209 = vector.broadcast %201 : f32 to vector<16x16xf32>
    %210 = arith.mulf %208, %209 : vector<16x16xf32>
    %211 = math.exp %210 : vector<16x16xf32>
    %212 = vector.broadcast %197 : f32 to vector<16x16xf32>
    %213 = arith.mulf %212, %211 : vector<16x16xf32>
    %214 = arith.addf %184, %213 : vector<16x16xf32>
    %c7_i32 = arith.constant 7 : i32
    %c4_i32_40 = arith.constant 4 : i32
    %215 = arith.muli %c4_i32_40, %c7_i32 : i32
    %c0_i32_41 = arith.constant 0 : i32
    %216 = arith.addi %215, %c0_i32_41 : i32
    %217 = arith.index_cast %arg0 : i32 to index
    %218 = arith.index_cast %216 : i32 to index
    %219 = memref.load %arg3[%217, %218] : memref<2x32xf32, #tpu.memory_space<smem>>
    %c1_i32_42 = arith.constant 1 : i32
    %220 = arith.addi %215, %c1_i32_42 : i32
    %221 = arith.index_cast %arg0 : i32 to index
    %222 = arith.index_cast %220 : i32 to index
    %223 = memref.load %arg3[%221, %222] : memref<2x32xf32, #tpu.memory_space<smem>>
    %c2_i32_43 = arith.constant 2 : i32
    %224 = arith.addi %215, %c2_i32_43 : i32
    %225 = arith.index_cast %arg0 : i32 to index
    %226 = arith.index_cast %224 : i32 to index
    %227 = memref.load %arg3[%225, %226] : memref<2x32xf32, #tpu.memory_space<smem>>
    %c3_i32_44 = arith.constant 3 : i32
    %228 = arith.addi %215, %c3_i32_44 : i32
    %229 = arith.index_cast %arg0 : i32 to index
    %230 = arith.index_cast %228 : i32 to index
    %231 = memref.load %arg3[%229, %230] : memref<2x32xf32, #tpu.memory_space<smem>>
    %232 = vector.broadcast %219 : f32 to vector<16x16xf32>
    %233 = arith.subf %1, %232 : vector<16x16xf32>
    %234 = vector.broadcast %223 : f32 to vector<16x16xf32>
    %235 = arith.subf %3, %234 : vector<16x16xf32>
    %236 = arith.mulf %233, %233 : vector<16x16xf32>
    %237 = arith.mulf %235, %235 : vector<16x16xf32>
    %238 = arith.addf %236, %237 : vector<16x16xf32>
    %239 = vector.broadcast %231 : f32 to vector<16x16xf32>
    %240 = arith.mulf %238, %239 : vector<16x16xf32>
    %241 = math.exp %240 : vector<16x16xf32>
    %242 = vector.broadcast %227 : f32 to vector<16x16xf32>
    %243 = arith.mulf %242, %241 : vector<16x16xf32>
    %244 = arith.addf %214, %243 : vector<16x16xf32>
    %c8_i32 = arith.constant 8 : i32
    %c0_45 = arith.constant 0 : index
    %c0_46 = arith.constant 0 : index
    %c0_47 = arith.constant 0 : index
    %245 = vector.load %arg6[%c0_45, %c0_46, %c0_47] : memref<1x16x16xf32, #tpu.memory_space<vmem>>, vector<1x16x16xf32>
    %246 = vector.shape_cast %245 : vector<1x16x16xf32> to vector<16x16xf32>
    %247 = vector.shape_cast %244 : vector<16x16xf32> to vector<1x16x16xf32>
    tpu.vector_store %arg6[%c0_45, %c0_46, %c0_47], %247 {strides = array<i32>} : memref<1x16x16xf32, #tpu.memory_space<vmem>>, vector<1x16x16xf32>,
    return
  }
  func.func @transform_0(%arg0: i32, %arg1: i32, %arg2: i32) -> (i32, i32) {
    %c0_i32 = arith.constant 0 : i32
    %c0_i32_0 = arith.constant 0 : i32
    %c0_i32_1 = arith.constant 0 : i32
    return %c0_i32, %c0_i32_0 : i32, i32
  }
  func.func @transform_1(%arg0: i32, %arg1: i32, %arg2: i32) -> (i32, i32, i32) {
    %c0_i32 = arith.constant 0 : i32
    return %arg0, %arg1, %arg2 : i32, i32, i32
  }
  func.func @transform_2(%arg0: i32, %arg1: i32, %arg2: i32) -> (i32, i32, i32) {
    %c0_i32 = arith.constant 0 : i32
    return %arg0, %arg1, %arg2 : i32, i32, i32
  }
  func.func @transform_3(%arg0: i32, %arg1: i32, %arg2: i32) -> (i32, i32, i32) {
    %c0_i32 = arith.constant 0 : i32
    return %arg0, %arg1, %arg2 : i32, i32, i32
  }
}

</mosaic_0001>

<bundles_post_ra>
// kernel: tpu_custom_call.1
= control target key start
LH: loop header
LB: loop body
LE: loop exit
PB: predicated region body
PF: predicated region fallthrough
CT: control target
= control target key end

     0   :  { %s1441_s0 = inlined_call_operand.hbm [shape: f32[2,32], index: 0, kind: input, shape index: {}]   ;;  %s1442_s1 = inlined_call_operand.hbm [shape: f32[2,16,16], index: 1, kind: input, shape index: {}]   ;;  %s1443_s2 = inlined_call_operand.hbm [shape: f32[2,16,16], index: 2, kind: input, shape index: {}]   ;;  %s1444_s3 = inlined_call_operand.hbm [shape: f32[2,16,16], index: 3, kind: output, shape index: {}]  }
   0x1   :  { %1449 = sst [smem:[#allocation14_spill]] %s1441_s0 }
   0x2   :  { %1450 = sst [smem:[#allocation15_spill]] %s1442_s1 }
   0x3   :  { %8 = vsyncpa [#allocation5], 0 }
   0x4   :  { %9 = vsyncpa [#allocation3], 0 }
   0x5   :  { %11 = vsyncpa [#allocation3 + $0x1], 0 }
   0x6   :  { %12 = vsyncpa [#allocation8], 0 }
   0x7   :  { %14 = vsyncpa [#allocation8 + $0x1], 0 }
   0x8   :  { %15 = vsyncpa [#allocation4], 0 }
   0x9   :  { %17 = vsyncpa [#allocation4 + $0x1], 0  ;;  %s1024_s12 = smov 0   ;;  %s1026_s13 = smov 0  }
   0xa   :  { %s1028_s14 = smov 0   ;;  %s1030_s15 = smov 0  }
   0xb   :  { %s1032_s16 = smov 0   ;;  %s1034_s17 = smov 0  }
   0xc LB: > { %s692_s18 = sadd.s32 4294967295, %s994_s17   ;;  %s693_s19 = sadd.s32 4294967294, %s994_s17   ;;  %s994_s17 = sphi %s1034_s17, %s23_s17   ;;  %s990_s16 = sphi %s1032_s16, %s1468_s16   ;;  %s986_s15 = sphi %s1030_s15, %s1467_s15   ;;  %s982_s14 = sphi %s1028_s14, %s1466_s14   ;;  %s978_s13 = sphi %s1026_s13, %s1465_s13   ;;  %s974_s12 = sphi %s1024_s12, %s1464_s12  }
   0xd   : > { %s74_s20 = sadd.s32 1, %s982_s14  ;;  %p81_p0 = scmp.ne.s32.totalorder %s982_s14, %s978_s13 }
   0xe   : > { %p82_p1 = scmp.eq.s32.totalorder %s994_s17, 0  ;;  %p87_p2 = scmp.ne.s32.totalorder %s978_s13, %s974_s12 }
   0xf   : > { %p1062_p3 = scmp.eq.s32.totalorder %s692_s18, 0  ;;  %p145_p4 = scmp.eq.s32.totalorder %s692_s18, 1 }
  0x10   : > { %p83_p5 = por %p82_p1, %p81_p0  ;;  %p151_p6 = scmp.eq.s32.totalorder %s693_s19, 1 }
  0x11   : > { %s1451_s21 = scalar_select %p1062_p3, 1, 0 }
  0x12   : > { %p1068_p7 = por %p1062_p3, %p87_p2  ;;  %p1072_p8 = por %p145_p4, %p81_p0 }
  0x13   : > { %p1076_p9 = por %p151_p6, %p87_p2  ;;  %p694_p10 = scmp.ge.s32.totalorder %s994_s17, 1 }
  0x14   : > { %s1452_s22 = scalar_select %p1068_p7, 1, 0 }
  0x15   : > { %s1453_s23 = scalar_select %p1072_p8, 1, 0 }
  0x16   : > { %s1454_s24 = scalar_select %p1076_p9, 1, 0 }
  0x17   : > { %p158_p11 = scmp.lt.s32.totalorder %s994_s17, 3  ;;  %p743_p1 = scmp.lt.s32.totalorder %s994_s17, 2 }
  0x18   : > { %s1089_s26 = sand.u32 1, %s982_s14   ;;  %s42_s28 = sadd.s32 1, %s990_s16 }
  0x19   : > { %p1083_p13 = pnand %p694_p10, %p158_p11  ;;  %p1093_p4 = pnand %p743_p1, %p83_p5 }
  0x1a   : > { %s697_s29 = sshll.u32 %s1089_s26, 4  ;;  %p44_p6 = scmp.ge.s32.totalorder %s42_s28, 2 }
  0x1b   : > { %p727_p0 = pneg %p1083_p13  ;;  %s1457_s0 = sld [smem:[#allocation14_spill]] }
  0x1d   : > { %p728_p2 = pnand %p727_p0, %p1062_p3 }
  0x1f   : > { %p833_p11 = pneg %p728_p2 }
  0x21   : > { %s831_s5 = scalar_lea.hbm %s1457_s0, 32 }
  0x22   : > { %p832_p10 = scmp.ne.s32.totalorder %s1457_s0, %s831_s5  ;;  %p838_p5 = scmp.lt.u32.totalorder %s831_s5, %s1457_s0 }
  0x24   : > { %p834_p12 = pnand %p833_p11, %p832_p10 }
  0x26   : > { %p835_p9 = pneg %p834_p12 }
  0x28   : > { %p840_p1 = pnand %p838_p5, %p835_p9 }
  0x2a   : > { %843 = shalt.err (!%p840_p1)
}
  0x2b   : > { %s996_s10 = smov [#allocation2]   ;;  %s1470_s28 = smov (%p44_p6, %s42_s28), 0 }
  0x2c   : > { %730 = dma.hbm_to_smem (!%p728_p2), %s1457_s0, 32, %s996_s10, [#allocation5]  }
  0x2d   : > { %s714_s19 = sshll.u32 %s990_s16, 8  ;;  %s67_s30 = ssub.s32 %s990_s16, %s1470_s28 }
  0x2e   : > { %s1458_s1 = sld [smem:[#allocation15_spill]]  ;;  %p72_p9 = scmp.eq.s32.totalorder %s67_s30, 0 }
  0x2f   : > { %s184_s7 = scalar_lea.vmem [#allocation6], %s697_s29  ;;  %s181_s10 = scalar_lea.sflag [#allocation3], %s1089_s26 }
  0x30   : > { %s194_s8 = sshll.u32 %s184_s7, 4  ;;  %p846_p0 = pneg %p1093_p4  ;;  %s1127_s8 = int_to_ptr.vmem [resolvable:$true] %s194_s8 }
  0x31   : > { %s1132_s9 = scalar_select %p72_p9, %s982_s14, %s74_s20  }
  0x34   : > { %s1123_s6 = scalar_lea.hbm %s1458_s1, %s714_s19  ;;  %s849_s30 = scalar_lea.hbm %s1458_s1, 512 }
  0x35   : > { %s844_s11 = scalar_lea.hbm %s1123_s6, 256  ;;  %p850_p10 = scmp.lt.u32.totalorder %s1123_s6, %s1458_s1 }
  0x36   : > { %p845_p12 = scmp.ne.s32.totalorder %s1123_s6, %s844_s11  ;;  %p851_p11 = scmp.lt.u32.totalorder %s849_s30, %s844_s11 }
  0x37   : > { %p853_p1 = scmp.lt.u32.totalorder %s844_s11, %s1123_s6 }
  0x38   : > { %p847_p2 = pnand %p846_p0, %p845_p12  ;;  %p852_p5 = por %p851_p11, %p850_p10 }
  0x3a   : > { %p848_p6 = pneg %p847_p2  ;;  %p854_p9 = por %p853_p1, %p852_p5 }
  0x3c   : > { %p855_p8 = pnand %p854_p9, %p848_p6 }
  0x3e   : > { %858 = shalt.err (!%p855_p8)
}
  0x3f   : > { %s859_s20 = scalar_lea.vmem %s1127_s8, 256  ;;  %s997_s18 = smov [#allocation6]  }
  0x40   : > { %p860_p12 = scmp.ne.s32.totalorder %s1127_s8, %s859_s20  ;;  %s864_s4 = sshll.u32 %s997_s18, 4  ;;  %s865_s4 = int_to_ptr.vmem [resolvable:$false] %s864_s4 }
  0x41   : > { %s866_s5 = scalar_lea.vmem %s865_s4, 512  ;;  %p867_p3 = scmp.lt.s32.totalorder %s1127_s8, %s865_s4 }
  0x42   : > { %p862_p2 = pnand %p860_p12, %p846_p0  ;;  %p868_p10 = scmp.lt.s32.totalorder %s866_s5, %s859_s20 }
  0x44   : > { %p863_p7 = pneg %p862_p2  ;;  %p869_p11 = por %p868_p10, %p867_p3 }
  0x46   : > { %p870_p5 = pnand %p869_p11, %p863_p7 }
  0x48   : > { %873 = shalt.err (!%p870_p5)
}
  0x49   : > { %s998_s11 = smov 128   ;;  %s999_s30 = smov 8  }
  0x4a   : > { %734 = dma.hbm_to_vmem [thread:$0]  (!%p1093_p4), %s1123_s6, 256, %s1127_s8, %s181_s10, %s998_s11, %s998_s11, %s999_s30  }
  0x4b   : > { %s1170_s18 = scalar_lea.hbm %s1443_s2, %s714_s19  ;;  %s208_s4 = scalar_lea.vmem [#allocation7], %s697_s29 }
  0x4c   : > { %s218_s5 = sshll.u32 %s208_s4, 4  ;;  %s205_s0 = scalar_lea.sflag [#allocation8], %s1089_s26  ;;  %s1174_s5 = int_to_ptr.vmem [resolvable:$true] %s218_s5 }
  0x4d   : > { %s874_s1 = scalar_lea.hbm %s1170_s18, 256  ;;  %s879_s19 = scalar_lea.hbm %s1443_s2, 512 }
  0x4e   : > { %p875_p3 = scmp.ne.s32.totalorder %s1170_s18, %s874_s1  ;;  %p880_p6 = scmp.lt.u32.totalorder %s1170_s18, %s1443_s2 }
  0x4f   : > { %p881_p1 = scmp.lt.u32.totalorder %s879_s19, %s874_s1  ;;  %p883_p12 = scmp.lt.u32.totalorder %s874_s1, %s1170_s18 }
  0x50   : > { %p877_p7 = pnand %p875_p3, %p846_p0 }
  0x51   : > { %p882_p9 = por %p881_p1, %p880_p6 }
  0x52   : > { %p878_p8 = pneg %p877_p7 }
  0x53   : > { %p884_p2 = por %p883_p12, %p882_p9 }
  0x55   : > { %p885_p10 = pnand %p884_p2, %p878_p8 }
  0x57   : > { %888 = shalt.err (!%p885_p10)
}
  0x58   : > { %s889_s29 = scalar_lea.vmem %s1174_s5, 256  ;;  %s1000_s20 = smov [#allocation7]  }
  0x59   : > { %p890_p11 = scmp.ne.s32.totalorder %s1174_s5, %s889_s29  ;;  %s894_s4 = sshll.u32 %s1000_s20, 4  ;;  %s895_s4 = int_to_ptr.vmem [resolvable:$false] %s894_s4 }
  0x5a   : > { %s896_s6 = scalar_lea.vmem %s895_s4, 512  ;;  %p897_p7 = scmp.lt.s32.totalorder %s1174_s5, %s895_s4 }
  0x5b   : > { %p892_p5 = pnand %p890_p11, %p846_p0  ;;  %p898_p6 = scmp.lt.s32.totalorder %s896_s6, %s889_s29 }
  0x5d   : > { %p893_p3 = pneg %p892_p5  ;;  %p899_p1 = por %p898_p6, %p897_p7 }
  0x5f   : > { %p900_p9 = pnand %p899_p1, %p893_p3 }
  0x61   : > { %903 = shalt.err (!%p900_p9)
}
  0x62   : > { %737 = dma.hbm_to_vmem [thread:$0]  (!%p1093_p4), %s1170_s18, 256, %s1174_s5, %s205_s0, %s998_s11, %s998_s11, %s999_s30  }
  0x63   : > { %230 = sbr.rel (%p1083_p13) target bundleno = 200 (0xc8), region = 32  ;;  %p1459_p0 = scmp.ne.s32.totalorder (!%p1083_p13), %s1451_s21, 0 }
  0x6a   : > { %957 = dma.done.wait (%p1459_p0), [#allocation5], 32  }
  0x6b   : > { %959 = vsyncadd (%p1459_p0), [#allocation5], 4294967264  ;;  %s1212_s1 = sand.u32 1, %s978_s13   ;;  %p1460_p4 = scmp.ne.s32.totalorder %s1452_s22, 0 }
  0x6c   : > { %s1215_s27 = sshll.u32 %s1212_s1, 4  ;;  %s237_s26 = scalar_lea.sflag [#allocation3], %s1212_s1 }
  0x6d   : > { %s240_s0 = scalar_lea.vmem [#allocation6], %s1215_s27 }
  0x6e   : > { %961 = dma.done.wait (%p1460_p4), %s237_s26, 256  }
  0x6f   : > { %963 = vsyncadd (%p1460_p4), %s237_s26, 4294967040  ;;  %s246_s21 = scalar_lea.sflag [#allocation8], %s1212_s1  ;;  %s249_s25 = scalar_lea.vmem [#allocation7], %s1215_s27 }
  0x70   : > { %965 = dma.done.wait (%p1460_p4), %s246_s21, 256  }
  0x71   : > { %967 = vsyncadd (%p1460_p4), %s246_s21, 4294967040 }
  0x72   : > { %254 = sfence }
  0x73   : > { %s1230_s11 = sshll.u32 %s986_s15, 7  ;;  %v1238_v0 = vld [vmem:[%s240_s0] sm:$0xff]  ;;  %v1240_v1 = vld [vmem:[%s240_s0 + $0x8] sm:$0xff]  ;;  %vm541_vm0 = vcmask 130048   ;;  %p1461_p8 = scmp.ne.s32.totalorder %s1453_s23, 0 }
  0x74   : > { %s286_s30 = sld [smem:[#allocation2 + %s1230_s11]]  ;;  %s287_s18 = sadd.s32 1, %s1230_s11  ;;  %v1243_v2 = vld [vmem:[%s249_s25] sm:$0xff]  ;;  %v1245_v3 = vld [vmem:[%s249_s25 + $0x8] sm:$0xff] }
  0x75   : > { %s288_s5 = sld [smem:[#allocation2 + %s287_s18]]  ;;  %s291_s8 = sadd.s32 3, %s1230_s11 }
  0x76   : > { %s1235_s19 = sld [smem:[#allocation2 + %s291_s8]]  ;;  %s317_s10 = sadd.s32 4, %s1230_s11 }
  0x77   : > { %s318_s22 = sld [smem:[#allocation2 + %s317_s10]]  ;;  %s319_s7 = sadd.s32 5, %s1230_s11 }
  0x78   : > { %s320_s29 = sld [smem:[#allocation2 + %s319_s7]]  ;;  %s323_s20 = sadd.s32 7, %s1230_s11 }
  0x79   : > { %s1250_s4 = sld [smem:[#allocation2 + %s323_s20]]  ;;  %s349_s6 = sadd.s32 8, %s1230_s11 }
  0x7a   : > { %v293_v4 = vstv %s286_s30  ;;  %s1255_s26 = sld [smem:[#allocation2 + %s349_s6]]  ;;  %s351_s0 = sadd.s32 9, %s1230_s11 }
  0x7b   : > { %v294_v5 = vsub.f32 %v1238_v0, %v293_v4  ;;  %v295_v6 = vsub.f32 %v1240_v1, %v293_v4  ;;  %v296_v7 = vstv %s288_s5  ;;  %s1258_s21 = sld [smem:[#allocation2 + %s351_s0]]  ;;  %s355_s25 = sadd.s32 11, %s1230_s11 }
  0x7c   : > { %v297_v8 = vsub.f32 %v1243_v2, %v296_v7  ;;  %v298_v9 = vsub.f32 %v1245_v3, %v296_v7  ;;  %v305_v15 = vstv %s1235_s19  ;;  %s381_s30 = sadd.s32 12, %s1230_s11  ;;  %s1267_s18 = sld [smem:[#allocation2 + %s355_s25]] }
  0x7d   : > { %v299_v10 = vmul.f32 %v294_v5, %v294_v5  ;;  %v300_v11 = vmul.f32 %v295_v6, %v295_v6  ;;  %v325_v14 = vstv %s318_s22  ;;  %s383_s5 = sadd.s32 13, %s1230_s11  ;;  %s1270_s8 = sld [smem:[#allocation2 + %s381_s30]] }
  0x7e   : > { %v301_v12 = vmul.f32 %v297_v8, %v297_v8  ;;  %v302_v13 = vmul.f32 %v298_v9, %v298_v9  ;;  %v326_v16 = vsub.f32 %v1238_v0, %v325_v14  ;;  %v327_v17 = vsub.f32 %v1240_v1, %v325_v14  ;;  %s1272_s19 = sld [smem:[#allocation2 + %s383_s5]]  ;;  %s387_s10 = sadd.s32 15, %s1230_s11 }
  0x7f   : > { %v328_v18 = vstv %s320_s29  ;;  %v337_v29 = vstv %s1250_s4  ;;  %s413_s22 = sadd.s32 16, %s1230_s11  ;;  %s1279_s7 = sld [smem:[#allocation2 + %s387_s10]] }
  0x80   : > { %v303_v19 = vadd.f32 %v301_v12, %v299_v10  ;;  %v304_v20 = vadd.f32 %v302_v13, %v300_v11  ;;  %v329_v21 = vsub.f32 %v1243_v2, %v328_v18  ;;  %v330_v22 = vsub.f32 %v1245_v3, %v328_v18  ;;  %s415_s29 = sadd.s32 17, %s1230_s11  ;;  %s289_s20 = sadd.s32 2, %s1230_s11 }
  0x81   : > { %v331_v23 = vmul.f32 %v326_v16, %v326_v16  ;;  %v332_v24 = vmul.f32 %v327_v17, %v327_v17  ;;  %v357_v30 = vstv %s1255_s26  ;;  %v360_v31 = vstv %s1258_s21  ;;  %s1287_s4 = sld [smem:[#allocation2 + %s413_s22]]  ;;  %s321_s6 = sadd.s32 6, %s1230_s11 }
  0x82   : > { %v306_v25 = vmul.f32 %v305_v15, %v303_v19  ;;  %v333_v26 = vmul.f32 %v329_v21, %v329_v21  ;;  %v334_v27 = vmul.f32 %v330_v22, %v330_v22  ;;  %v307_v28 = vmul.f32 %v305_v15, %v304_v20  ;;  %s1290_s26 = sld [smem:[#allocation2 + %s415_s29]]  ;;  %s419_s0 = sadd.s32 19, %s1230_s11 }
  0x83   : > { %v358_v35 = vsub.f32 %v1238_v0, %v357_v30  ;;  %v359_v36 = vsub.f32 %v1240_v1, %v357_v30  ;;  %v361_v37 = vsub.f32 %v1243_v2, %v360_v31  ;;  %v362_v38 = vsub.f32 %v1245_v3, %v360_v31  ;;  %s1293_s21 = sld [smem:[#allocation2 + %s289_s20]]  ;;  %s445_s25 = sadd.s32 20, %s1230_s11 }
  0x84   : > { %v308_v32 = vmul.f32 1.442695, %v306_v25  ;;  %v335_v33 = vadd.f32 %v333_v26, %v331_v23  ;;  %v336_v34 = vadd.f32 %v334_v27, %v332_v24  ;;  %v310_v41 = vmul.f32 1.442695, %v307_v28  ;;  %s1297_s30 = sld [smem:[#allocation2 + %s321_s6]]  ;;  %s447_s5 = sadd.s32 21, %s1230_s11 }
  0x85   : > { %v363_v42 = vmul.f32 %v358_v35, %v358_v35  ;;  %v364_v43 = vmul.f32 %v359_v36, %v359_v36  ;;  %v365_v44 = vmul.f32 %v361_v37, %v361_v37  ;;  %v366_v46 = vmul.f32 %v362_v38, %v362_v38  ;;  %s353_s10 = sadd.s32 10, %s1230_s11  ;;  %s1305_s22 = sld [smem:[#allocation2 + %s419_s0]] }
  0x86   : > { %v338_v39 = vmul.f32 %v337_v29, %v335_v33  ;;  %v339_v40 = vmul.f32 %v337_v29, %v336_v34  ;;  %799 = vpow2.f32 %v308_v32  ;;  %v369_v47 = vstv %s1267_s18  ;;  %s1309_s18 = sld [smem:[#allocation2 + %s445_s25]]  ;;  %s451_s29 = sadd.s32 23, %s1230_s11 }
  0x87   : > { %v367_v49 = vadd.f32 %v365_v44, %v363_v42  ;;  %v389_v50 = vstv %s1270_s8  ;;  %v392_v51 = vstv %s1272_s19  ;;  %v368_v52 = vadd.f32 %v366_v46, %v364_v43  ;;  %s1312_s8 = sld [smem:[#allocation2 + %s447_s5]]  ;;  %s477_s20 = sadd.s32 24, %s1230_s11 }
  0x88   : > { %v340_v45 = vmul.f32 1.442695, %v338_v39  ;;  %v342_v48 = vmul.f32 1.442695, %v339_v40  ;;  %v390_v53 = vsub.f32 %v1238_v0, %v389_v50  ;;  %v391_v54 = vsub.f32 %v1240_v1, %v389_v50  ;;  %s1314_s19 = sld [smem:[#allocation2 + %s353_s10]]  ;;  %s483_s0 = sadd.s32 27, %s1230_s11 }
  0x89   : > { %v370_v55 = vmul.f32 %v369_v47, %v367_v49  ;;  %v393_v56 = vsub.f32 %v1243_v2, %v392_v51  ;;  %v394_v57 = vsub.f32 %v1245_v3, %v392_v51  ;;  %v371_v58 = vmul.f32 %v369_v47, %v368_v52  ;;  %s1328_s6 = sld [smem:[#allocation2 + %s477_s20]]  ;;  %s511_s25 = sadd.s32 29, %s1230_s11 }
  0x8a   : > { %801 = vpow2.f32 %v340_v45  ;;  %v395_v59 = vmul.f32 %v390_v53, %v390_v53  ;;  %v396_v60 = vmul.f32 %v391_v54, %v391_v54  ;;  %v401_v61 = vstv %s1279_s7  ;;  %s479_s7 = sadd.s32 25, %s1230_s11  ;;  %s1345_s5 = sld [smem:[#allocation2 + %s483_s0]] }
  0x8b   : > { %803 = vpow2.f32 %v310_v41  ;;  %v397_v62 = vmul.f32 %v393_v56, %v393_v56  ;;  %v398_v63 = vmul.f32 %v394_v57, %v394_v57  ;;  %v421_v4 = vstv %s1287_s4  ;;  %s1326_s4 = sld [smem:[#allocation2 + %s451_s29]]  ;;  %s513_s0 = sadd.s32 30, %s1230_s11 }
  0x8c   : > { %805 = vpow2.f32 %v342_v48  ;;  %v372_v5 = vmul.f32 1.442695, %v370_v55  ;;  %v422_v6 = vsub.f32 %v1238_v0, %v421_v4  ;;  %v423_v7 = vsub.f32 %v1240_v1, %v421_v4 }
  0x8d   : > { %v424_v8 = vstv %s1290_s26  ;;  %v374_v9 = vmul.f32 1.442695, %v371_v58  ;;  %v399_v10 = vadd.f32 %v397_v62, %v395_v59  ;;  %v400_v11 = vadd.f32 %v398_v63, %v396_v60  ;;  %s1333_s26 = sld [smem:[#allocation2 + %s479_s7]]  ;;  %s449_s7 = sadd.s32 22, %s1230_s11 }
  0x8e   : > { %v425_v12 = vsub.f32 %v1243_v2, %v424_v8  ;;  %v426_v13 = vsub.f32 %v1245_v3, %v424_v8  ;;  %v427_v14 = vmul.f32 %v422_v6, %v422_v6  ;;  %v428_v15 = vmul.f32 %v423_v7, %v423_v7 }
  0x8f   : > { %v312_v16 = vstv %s1293_s21  ;;  %v402_v17 = vmul.f32 %v401_v61, %v399_v10  ;;  %v403_v18 = vmul.f32 %v401_v61, %v400_v11  ;;  %v344_v21 = vstv %s1297_s30  ;;  %s509_s21 = sadd.s32 28, %s1230_s11  ;;  %s385_s30 = sadd.s32 14, %s1230_s11 }
  0x90   : > { %v429_v19 = vmul.f32 %v425_v12, %v425_v12  ;;  %v800_v20 = vpop.eup %799  ;;  %807 = vpow2.f32 %v372_v5  ;;  %v430_v22 = vmul.f32 %v426_v13, %v426_v13  ;;  %v433_v23 = vstv %s1305_s22  ;;  %s1347_s10 = sld [smem:[#allocation2 + %s509_s21]] }
  0x91   : > { %809 = vpow2.f32 %v374_v9  ;;  %v404_v24 = vmul.f32 1.442695, %v402_v17  ;;  %v453_v26 = vstv %s1309_s18  ;;  %v456_v31 = vstv %s1312_s8  ;;  %s1349_s22 = sld [smem:[#allocation2 + %s511_s25]]  ;;  %s417_s18 = sadd.s32 18, %s1230_s11 }
  0x92   : > { %v431_v25 = vadd.f32 %v429_v19, %v427_v14  ;;  %v432_v28 = vadd.f32 %v430_v22, %v428_v15  ;;  %v454_v29 = vsub.f32 %v1238_v0, %v453_v26  ;;  %v455_v30 = vsub.f32 %v1240_v1, %v453_v26  ;;  %s1354_s8 = sld [smem:[#allocation2 + %s385_s30]]  ;;  %s277_s25 = scalar_lea.vmem [#allocation9], %s1215_s27 }
  0x93   : > { %v406_v33 = vmul.f32 1.442695, %v403_v18  ;;  %v457_v35 = vsub.f32 %v1243_v2, %v456_v31  ;;  %v376_v36 = vstv %s1314_s19  ;;  %v458_v38 = vsub.f32 %v1245_v3, %v456_v31  ;;  %s515_s19 = sadd.s32 31, %s1230_s11  ;;  %s1357_s29 = sld [smem:[#allocation2 + %s417_s18]] }
  0x94   : > { %v802_v27 = vpop.eup %801  ;;  %v434_v34 = vmul.f32 %v433_v23, %v431_v25  ;;  %v435_v37 = vmul.f32 %v433_v23, %v432_v28  ;;  %v313_v40 = vmul.f32 %v800_v20, %v312_v16  ;;  %v459_v42 = vmul.f32 %v454_v29, %v454_v29  ;;  %s1364_s20 = sld [smem:[#allocation2 + %s515_s19]]  ;;  %s561_s30 = sshll.u32 %s277_s25, 4  ;;  %s1392_s30 = int_to_ptr.vmem [resolvable:$true] %s561_s30 }
  0x95   : > { %v804_v32 = vpop.eup %803  ;;  %v345_v41 = vmul.f32 %v802_v27, %v344_v21  ;;  %v460_v43 = vmul.f32 %v455_v30, %v455_v30  ;;  %811 = vpow2.f32 %v404_v24  ;;  %v461_v45 = vmul.f32 %v457_v35, %v457_v35  ;;  %s514_s21 = sld [smem:[#allocation2 + %s513_s0]]  ;;  %s904_s27 = scalar_lea.vmem %s1392_s30, 256 }
  0x96   : > { %v806_v39 = vpop.eup %805  ;;  %v436_v44 = vmul.f32 1.442695, %v434_v34  ;;  %v462_v46 = vmul.f32 %v458_v38, %v458_v38  ;;  %813 = vpow2.f32 %v406_v33  ;;  %v438_v47 = vmul.f32 1.442695, %v435_v37  ;;  %p905_p13 = scmp.ne.s32.totalorder %s1392_s30, %s904_s27  ;;  %s1001_s18 = smov [#allocation9]  }
  0x97   : > { %v465_v48 = vstv %s1326_s4  ;;  %v485_v49 = vstv %s1328_s6  ;;  %v314_v50 = vmul.f32 %v804_v32, %v312_v16  ;;  %v346_v51 = vmul.f32 %v806_v39, %v344_v21  ;;  %s1371_s4 = sld [smem:[#allocation2 + %s449_s7]]  ;;  %s481_s6 = sadd.s32 26, %s1230_s11 }
  0x98   : > { %v463_v52 = vadd.f32 %v461_v45, %v459_v42  ;;  %v464_v53 = vadd.f32 %v462_v46, %v460_v43  ;;  %v347_v54 = vadd.f32 %v345_v41, %v313_v40  ;;  %v486_v55 = vsub.f32 %v1238_v0, %v485_v49  ;;  %s716_s11 = sshll.u32 %s986_s15, 8  ;;  %s545_s15 = scalar_lea.sflag [#allocation4], %s1212_s1 }
  0x99   : > { %v487_v56 = vsub.f32 %v1240_v1, %v485_v49  ;;  %v488_v57 = vstv %s1333_s26  ;;  %815 = vpow2.f32 %v436_v44  ;;  %v348_v6 = vadd.f32 %v346_v51, %v314_v50  ;;  %s1380_s26 = sld [smem:[#allocation2 + %s481_s6]]  ;;  %p906_p12 = pnand %p905_p13, %p1461_p8 }
  0x9a   : > { %v808_v58 = vpop.eup %807  ;;  %v466_v59 = vmul.f32 %v465_v48, %v463_v52  ;;  %v467_v60 = vmul.f32 %v465_v48, %v464_v53  ;;  %v489_v61 = vsub.f32 %v1243_v2, %v488_v57  ;;  %817 = vpow2.f32 %v438_v47 }
  0x9b   : > { %v810_v62 = vpop.eup %809  ;;  %v490_v63 = vsub.f32 %v1245_v3, %v488_v57  ;;  %v491_v4 = vmul.f32 %v486_v55, %v486_v55  ;;  %v492_v5 = vmul.f32 %v487_v56, %v487_v56  ;;  %v497_v11 = vstv %s1345_s5  ;;  %p907_p2 = pneg %p906_p12 }
  0x9c   : > { %v468_v7 = vmul.f32 1.442695, %v466_v59  ;;  %v470_v8 = vmul.f32 1.442695, %v467_v60  ;;  %v493_v9 = vmul.f32 %v489_v61, %v489_v61  ;;  %v517_v12 = vstv %s1347_s10 }
  0x9d   : > { %v494_v10 = vmul.f32 %v490_v63, %v490_v63  ;;  %v520_v13 = vstv %s1349_s22  ;;  %v377_v14 = vmul.f32 %v808_v58, %v376_v36  ;;  %v518_v16 = vsub.f32 %v1238_v0, %v517_v12  ;;  %s1390_s22 = scalar_lea.hbm %s1444_s3, %s716_s11 }
  0x9e   : > { %819 = vpow2.f32 %v468_v7  ;;  %v495_v15 = vadd.f32 %v493_v9, %v491_v4  ;;  %v378_v17 = vmul.f32 %v810_v62, %v376_v36  ;;  %v519_v19 = vsub.f32 %v1240_v1, %v517_v12 }
  0x9f   : > { %821 = vpow2.f32 %v470_v8  ;;  %v496_v18 = vadd.f32 %v494_v10, %v492_v5  ;;  %v812_v20 = vpop.eup %811  ;;  %v408_v21 = vstv %s1354_s8  ;;  %v521_v23 = vsub.f32 %v1243_v2, %v520_v13  ;;  %s908_s8 = sshll.u32 %s1001_s18, 4  ;;  %s909_s8 = int_to_ptr.vmem [resolvable:$false] %s908_s8 }
  0xa0   : > { %v498_v22 = vmul.f32 %v497_v11, %v495_v15  ;;  %v522_v24 = vsub.f32 %v1245_v3, %v520_v13  ;;  %v814_v25 = vpop.eup %813  ;;  %v440_v26 = vstv %s1357_s29  ;;  %v523_v0 = vmul.f32 %v518_v16, %v518_v16  ;;  %s910_s19 = scalar_lea.vmem %s909_s8, 512  ;;  %p911_p10 = scmp.lt.s32.totalorder %s1392_s30, %s909_s8 }
  0xa1   : > { %v499_v27 = vmul.f32 %v497_v11, %v496_v18  ;;  %v524_v28 = vmul.f32 %v519_v19, %v519_v19  ;;  %v379_v29 = vadd.f32 %v377_v14, %v347_v54  ;;  %v525_v31 = vmul.f32 %v521_v23, %v521_v23  ;;  %p912_p11 = scmp.lt.s32.totalorder %s910_s19, %s904_s27 }
  0xa2   : > { %v500_v30 = vmul.f32 1.442695, %v498_v22  ;;  %v526_v32 = vmul.f32 %v522_v24, %v522_v24  ;;  %v380_v33 = vadd.f32 %v378_v17, %v348_v6  ;;  %v409_v1 = vmul.f32 %v812_v20, %v408_v21 }
  0xa3   : > { %v502_v34 = vmul.f32 1.442695, %v499_v27  ;;  %v529_v35 = vstv %s1364_s20  ;;  %v816_v36 = vpop.eup %815  ;;  %v410_v2 = vmul.f32 %v814_v25, %v408_v21  ;;  %v527_v3 = vadd.f32 %v525_v31, %v523_v0  ;;  %p913_p5 = por %p912_p11, %p911_p10 }
  0xa4   : > { %823 = vpow2.f32 %v500_v30  ;;  %v528_v37 = vadd.f32 %v526_v32, %v524_v28  ;;  %v818_v38 = vpop.eup %817  ;;  %v411_v41 = vadd.f32 %v409_v1, %v379_v29  ;;  %v441_v42 = vmul.f32 %v816_v36, %v440_v26 }
  0xa5   : > { %825 = vpow2.f32 %v502_v34  ;;  %v530_v39 = vmul.f32 %v529_v35, %v527_v3  ;;  %v472_v43 = vstv %s1371_s4  ;;  %v412_v45 = vadd.f32 %v410_v2, %v380_v33  ;;  %p914_p3 = pnand %p913_p5, %p907_p2 }
  0xa6   : > { %v531_v40 = vmul.f32 %v529_v35, %v528_v37  ;;  %v442_v46 = vmul.f32 %v818_v38, %v440_v26  ;;  %v443_v50 = vadd.f32 %v441_v42, %v411_v41  ;;  %v504_v54 = vstv %s1380_s26 }
  0xa7   : > { %v532_v47 = vmul.f32 1.442695, %v530_v39  ;;  %v536_v61 = vstv %s514_s21 }
  0xa8   : > { %v820_v44 = vpop.eup %819  ;;  %v534_v48 = vmul.f32 1.442695, %v531_v40  ;;  %v444_v52 = vadd.f32 %v442_v46, %v412_v45 }
  0xa9   : > { %v822_v49 = vpop.eup %821  ;;  %827 = vpow2.f32 %v532_v47  ;;  %v473_v51 = vmul.f32 %v820_v44, %v472_v43 }
  0xaa   : > { %829 = vpow2.f32 %v534_v48  ;;  %v474_v53 = vmul.f32 %v822_v49, %v472_v43 }
  0xab   : > { %v475_v57 = vadd.f32 %v473_v51, %v443_v50 }
  0xac   : > { %v476_v59 = vadd.f32 %v474_v53, %v444_v52 }
  0xae   : > { %v824_v55 = vpop.eup %823 }
  0xaf   : > { %v826_v56 = vpop.eup %825  ;;  %v505_v58 = vmul.f32 %v824_v55, %v504_v54 }
  0xb0   : > { %v506_v60 = vmul.f32 %v826_v56, %v504_v54 }
  0xb1   : > { %v507_v62 = vadd.f32 %v505_v58, %v475_v57 }
  0xb2   : > { %v508_v4 = vadd.f32 %v506_v60, %v476_v59 }
  0xb3   : > { %v828_v63 = vpop.eup %827 }
  0xb4   : > { %v830_v5 = vpop.eup %829  ;;  %v537_v6 = vmul.f32 %v828_v63, %v536_v61 }
  0xb5   : > { %v538_v7 = vmul.f32 %v830_v5, %v536_v61 }
  0xb6   : > { %v539_v8 = vadd.f32 %v537_v6, %v507_v62 }
  0xb7   : > { %v540_v9 = vadd.f32 %v538_v7, %v508_v4 }
  0xb8   : > { %542 = vst.msk [vmem:[%s277_s25] sm:$0xff] %vm541_vm0, %v539_v8 }
  0xb9   : > { %543 = vst.msk [vmem:[%s277_s25 + $0x8] sm:$0xff] %vm541_vm0, %v540_v9 }
  0xba   : > { %917 = shalt.err (!%p914_p3)
}
  0xbb   : > { %s918_s29 = scalar_lea.hbm %s1390_s22, 256  ;;  %s922_s4 = scalar_lea.hbm %s1444_s3, 512 }
  0xbc   : > { %p919_p7 = scmp.ne.s32.totalorder %s1390_s22, %s918_s29  ;;  %p923_p9 = scmp.lt.u32.totalorder %s1390_s22, %s1444_s3 }
  0xbd   : > { %p924_p0 = scmp.lt.u32.totalorder %s922_s4, %s918_s29  ;;  %p926_p13 = scmp.lt.u32.totalorder %s918_s29, %s1390_s22 }
  0xbe   : > { %p920_p6 = pnand %p919_p7, %p1461_p8 }
  0xbf   : > { %p925_p4 = por %p924_p0, %p923_p9 }
  0xc0   : > { %p921_p1 = pneg %p920_p6 }
  0xc1   : > { %p927_p12 = por %p926_p13, %p925_p4 }
  0xc3   : > { %p928_p2 = pnand %p927_p12, %p921_p1 }
  0xc5   : > { %931 = shalt.err (!%p928_p2)
}
  0xc6   : > { %s1002_s0 = smov 128   ;;  %s1003_s21 = smov 8  }
  0xc7   : > { %725 = dma.vmem_to_hbm [thread:$0]  (%p1461_p8), %s1392_s30, 256, %s1390_s22, %s545_s15, %s1002_s0, %s1002_s0, %s1003_s21  }
  0xc8 PF: > { %s576_s11 = sand.u32 1, %s974_s12   ;;  %p1462_p10 = scmp.ne.s32.totalorder %s1454_s24, 0 }
  0xc9   : > { %p1463_p11 = scmp.ge.s32.totalorder %s994_s17, 2  ;;  %s577_s25 = scalar_lea.sflag [#allocation4], %s576_s11 }
  0xcb   : > { %p739_p5 = pnand %p1463_p11, %p1462_p10 }
  0xcd   : > { %969 = dma.done.wait (!%p739_p5), %s577_s25, 256  }
  0xce   : > { %971 = vsyncadd (!%p739_p5), %s577_s25, 4294967040  ;;  %s23_s17 = sadd.s32 1, %s994_s17   ;;  %s1464_s12 = smov %s978_s13 }
  0xcf   : > { %p20_p3 = scmp.ge.s32.totalorder %s23_s17, 4   ;;  %s1465_s13 = smov %s982_s14 }
  0xd0   : > { %s1466_s14 = smov %s1132_s9  ;;  %s1467_s15 = smov %s990_s16 }
  0xd1   : > { %s1468_s16 = smov %s1470_s28  ;;  %22 = sbr.rel (!%p20_p3) target bundleno = 12 (0xc), region = 95 }
  0xd8   :  { %582 = vsyncpa [#allocation3], 1 }
  0xd9   :  { %584 = vsyncpa [#allocation3 + $0x1], 1 }
  0xda   :  { %585 = vsyncpa [#allocation8], 1 }
  0xdb   :  { %587 = vsyncpa [#allocation8 + $0x1], 1 }
  0xdc   :  { %588 = vsyncpa [#allocation4], 1 }
  0xdd   :  { %590 = vsyncpa [#allocation4 + $0x1], 1 }
  0xde   :  { %591 = vsyncpa [#allocation5], 1 }
  0xdf   :  { %593 = vsyncpa [#allocation5 + $0x1], 1 }

</bundles_post_ra>
